<compile_context>
chip_gen: v5e
topology: v5e:2x2
jax: 0.10.0
libtpu: 0.0.40
codegen_flags: <defaults>
</compile_context>

<pallas_src>
import math

import jax
import jax.numpy as jnp
from jax.experimental import pallas as pl
from jax.experimental.pallas import tpu as pltpu


def _soft_bent_kernel(params_ref, x_ref, out_ref):
    # params_ref: (2, L)  row 0 = exp(alphas), row 1 = exp(betas) (lane-tiled,
    #             VMEM-resident across the whole grid).
    # x_ref / out_ref: (TB, L)  batch rows on sublanes, (folded) channels on lanes.
    x = x_ref[...].astype(jnp.float32)

    ea = params_ref[0:1, :]  # (1, L) — broadcast over sublanes, computed once per tile
    eb = params_ref[1:2, :]

    # Shared-softplus: 2 transcendentals per element instead of 4.
    t = jnp.log1p(jnp.exp(-jnp.abs(x)))   # EUP: exp + log1p
    sp_pos = jnp.maximum(x, 0.0) + t      # softplus(x)
    sp_neg = sp_pos - x                   # softplus(-x)  (exact identity)

    out_ref[...] = (ea * sp_pos - eb * sp_neg).astype(out_ref.dtype)


def _fold_factor(B, C):
    """How many batch rows to fold into the lane dim so lane width % 128 == 0."""
    if C % 128 == 0:
        return 1                              # already lane-dense
    k0 = 128 // math.gcd(C, 128)
    if k0 > B or B % k0 != 0:
        return 1                              # fallback: channel-on-lanes (still correct)
    k = k0
    # Grow toward ~2048-wide lane rows while k keeps dividing B.
    while k * 2 <= B and B % (k * 2) == 0 and (k * 2) * C <= 2048:
        k *= 2
    return k


def soft_bent_forward(x, alphas, betas):
    """x: [B, C]; alphas/betas: [C]. Returns exp(a)*softplus(x) - exp(b)*softplus(-x)."""
    B, C = x.shape
    out_dtype = x.dtype

    # Hoist the parameter exponentials out of the kernel (one-time, tiny).
    params = jnp.stack([jnp.exp(alphas), jnp.exp(betas)], axis=0).astype(jnp.float32)

    k = _fold_factor(B, C)
    if k > 1:
        xr = x.reshape(B // k, k * C)         # free row-major reshape
        params = jnp.tile(params, (1, k))     # (2, k*C): params repeat every C lanes
    else:
        xr = x
    R, L = xr.shape

    # Byte-budgeted batch tile: ~2 MiB of x per grid step -> ~8 MiB total with
    # double-buffered x + out + resident params; safe on every chip generation.
    target_bytes = 2 * 1024 * 1024
    row_bytes = L * xr.dtype.itemsize
    if R >= 8:
        tb = min(max(8, (target_bytes // row_bytes) // 8 * 8), (R // 8) * 8)
        if pl.cdiv(R, tb) == 1 and R >= 16:
            tb = max(8, (R // 2) // 8 * 8)    # keep >=2 steps for v7x megacore
    else:
        tb = R                                # tiny batch: block == full first dim
    grid = (pl.cdiv(R, tb),)
    # TODO(synk): for extremely wide rows (L*4 bytes >> 2 MiB) a second, lane-dim
    # grid axis would be needed to bound VMEM; not required at these shapes.

    out = pl.pallas_call(
        _soft_bent_kernel,
        out_shape=jax.ShapeDtypeStruct((R, L), out_dtype),
        grid=grid,
        in_specs=[
            pl.BlockSpec((2, L), lambda i: (0, 0)),    # params: resident across grid
            pl.BlockSpec((tb, L), lambda i: (i, 0)),   # x: tiled over (folded) batch
        ],
        out_specs=pl.BlockSpec((tb, L), lambda i: (i, 0)),
        compiler_params=pltpu.CompilerParams(
            dimension_semantics=("parallel",),
            vmem_limit_bytes=32 * 1024 * 1024,
        ),
    )(params, xr)

    return out.reshape(B, C) if k > 1 else out


if __name__ == "__main__":
    key = jax.random.PRNGKey(0)
    k_x, k_a, k_b = jax.random.split(key, 3)

    batch_size = 8    # hparams['batch_size']
    channels = 16     # hparams['channels']

    # make_normal_batch: standard multivariate normal == iid N(0,1) per channel.
    x = jax.random.normal(k_x, (batch_size, channels), jnp.float32)
    # Module initializes alphas/betas to zeros (forward is then exactly x);
    # use small random values so the exp-scaling path is actually exercised.
    alphas = 0.1 * jax.random.normal(k_a, (channels,), jnp.float32)
    betas = 0.1 * jax.random.normal(k_b, (channels,), jnp.float32)
    # TODO(synk): `bias`, derivative(), error(), inverse() are not part of
    # forward() and are not implemented here.

    out = jax.block_until_ready(soft_bent_forward(x, alphas, betas))

    # Reference: the literal torch formula from the module.
    ref = (jnp.exp(alphas) * jnp.log1p(jnp.exp(x))
           - jnp.exp(betas) * jnp.log1p(jnp.exp(-x)))
    assert out.shape == (batch_size, channels)
    assert jnp.allclose(out, ref, atol=1e-5, rtol=1e-5), "mismatch vs reference"

    print("KERNEL_OK")
</pallas_src>

<mosaic_0001>
module attributes {stable_mosaic.version = 11 : i64} {
  func.func @_soft_bent_kernel(%arg0: i32, %arg1: memref<2x128xf32, #tpu.memory_space<vmem>>, %arg2: memref<1x128xf32, #tpu.memory_space<vmem>>, %arg3: memref<1x128xf32, #tpu.memory_space<vmem>>) attributes {dimension_semantics = [#tpu.dimension_semantics<parallel>], iteration_bounds = array<i64: 1>, scalar_prefetch = 0 : i64, scratch_operands = 0 : i64, tpu.core_type = #tpu.core_type<tc>, window_params = [{pipeline_mode = #tpu.pipeline_mode<synchronous>, transform_indices = @transform_0, window_bounds = array<i64: 2, 128>}, {transform_indices = @transform_1, window_bounds = array<i64: 1, 128>}, {transform_indices = @transform_2, window_bounds = array<i64: 1, 128>}]} {
    %c0 = arith.constant 0 : index
    %c0_0 = arith.constant 0 : index
    %0 = vector.load %arg2[%c0, %c0_0] : memref<1x128xf32, #tpu.memory_space<vmem>>, vector<1x128xf32>
    %c0_1 = arith.constant 0 : index
    %c0_2 = arith.constant 0 : index
    %1 = vector.load %arg1[%c0_1, %c0_2] : memref<2x128xf32, #tpu.memory_space<vmem>>, vector<1x128xf32>
    %c1 = arith.constant 1 : index
    %c0_3 = arith.constant 0 : index
    %2 = vector.load %arg1[%c1, %c0_3] : memref<2x128xf32, #tpu.memory_space<vmem>>, vector<1x128xf32>
    %3 = math.absf %0 : vector<1x128xf32>
    %cst = arith.constant 0.000000e+00 : f32
    %4 = vector.broadcast %cst : f32 to vector<1x128xf32>
    %5 = arith.subf %4, %3 : vector<1x128xf32>
    %6 = math.exp %5 : vector<1x128xf32>
    %7 = math.log1p %6 : vector<1x128xf32>
    %cst_4 = arith.constant 0.000000e+00 : f32
    %8 = vector.broadcast %cst_4 : f32 to vector<1x128xf32>
    %9 = arith.maximumf %0, %8 : vector<1x128xf32>
    %10 = arith.addf %9, %7 : vector<1x128xf32>
    %11 = arith.subf %10, %0 : vector<1x128xf32>
    %12 = arith.mulf %1, %10 : vector<1x128xf32>
    %13 = arith.mulf %2, %11 : vector<1x128xf32>
    %14 = arith.subf %12, %13 : vector<1x128xf32>
    %c0_5 = arith.constant 0 : index
    %c0_6 = arith.constant 0 : index
    %15 = vector.load %arg3[%c0_5, %c0_6] : memref<1x128xf32, #tpu.memory_space<vmem>>, vector<1x128xf32>
    tpu.vector_store %arg3[%c0_5, %c0_6], %14 {strides = array<i32>} : memref<1x128xf32, #tpu.memory_space<vmem>>, vector<1x128xf32>,
    return
  }
  func.func @transform_0(%arg0: i32) -> (i32, i32) {
    %c0_i32 = arith.constant 0 : i32
    %c0_i32_0 = arith.constant 0 : i32
    %c0_i32_1 = arith.constant 0 : i32
    return %c0_i32, %c0_i32_0 : i32, i32
  }
  func.func @transform_1(%arg0: i32) -> (i32, i32) {
    %c0_i32 = arith.constant 0 : i32
    %c0_i32_0 = arith.constant 0 : i32
    return %arg0, %c0_i32 : i32, i32
  }
  func.func @transform_2(%arg0: i32) -> (i32, i32) {
    %c0_i32 = arith.constant 0 : i32
    %c0_i32_0 = arith.constant 0 : i32
    return %arg0, %c0_i32 : i32, i32
  }
}

</mosaic_0001>

<bundles_post_ra>
// kernel: tpu_custom_call.1
= control target key start
LH: loop header
LB: loop body
LE: loop exit
PB: predicated region body
PF: predicated region fallthrough
CT: control target
= control target key end

     0   :  { %7 = vsyncpa [#allocation3], 0  ;;  %s193_s0 = inlined_call_operand.hbm [shape: f32[2,128], index: 0, kind: input, shape index: {}]   ;;  %s194_s1 = inlined_call_operand.hbm [shape: f32[1,128], index: 1, kind: input, shape index: {}]   ;;  %s195_s2 = inlined_call_operand.hbm [shape: f32[1,128], index: 2, kind: output, shape index: {}]  }
   0x1   :  { %8 = vsyncpa [#allocation6], 0 }
   0x2   :  { %9 = vsyncpa [#allocation4], 0  ;;  %s15_s11 = sshll.u32 %s193_s0, 4  ;;  %s166_s12 = smov [#allocation2]   ;;  %s16_s11 = int_to_ptr.hbm [resolvable:$true] %s15_s11 }
   0x3   :  { %s17_s13 = sshll.u32 %s166_s12, 4  ;;  %s26_s16 = sshll.u32 %s194_s1, 4  ;;  %s18_s13 = int_to_ptr.vmem [resolvable:$true] %s17_s13  ;;  %s27_s16 = int_to_ptr.hbm [resolvable:$true] %s26_s16 }
   0x4   :  { %20 = dma.hbm_to_vmem [thread:$0]  %s16_s11, 32, %s18_s13, [#allocation3]  }
   0x5   :  { %s167_s17 = smov [#allocation5]  }
   0x6   :  { %s28_s18 = sshll.u32 %s167_s17, 4  ;;  %s29_s18 = int_to_ptr.vmem [resolvable:$true] %s28_s18 }
   0x7   :  { %31 = dma.hbm_to_vmem [thread:$0]  %s27_s16, 16, %s29_s18, [#allocation6]  }
   0x8   :  { %160 = dma.done.wait [#allocation3], 32  }
   0x9   :  { %161 = vsyncadd [#allocation3], 4294967264 }
   0xa   :  { %162 = dma.done.wait [#allocation6], 16  }
   0xb   :  { %163 = vsyncadd [#allocation6], 4294967280  ;;  %v40_v0 = vld [vmem:[#allocation5] sm:$0x1]  ;;  %v41_v13 = vld [vmem:[#allocation2] sm:$0x1] }
   0xc   :  { %v43_v1 = vand.u32 2147483647, %v40_v0  ;;  %v56_v11 = vmax.f32 %v40_v0, 0.0  ;;  %v42_v16 = vld [vmem:[#allocation2 + $0x1] sm:$0x1]  ;;  %s168_s0 = smov [#allocation7]  }
   0xd   :  { %s68_s1 = sshll.u32 %s168_s0, 4  ;;  %s70_s21 = sshll.u32 %s195_s2, 4  ;;  %s69_s1 = int_to_ptr.vmem [resolvable:$true] %s68_s1  ;;  %s71_s21 = int_to_ptr.hbm [resolvable:$true] %s70_s21 }
   0xe   :  { %v44_v2 = vsub.f32 0.0, %v43_v1 }
  0x10   :  { %v45_v3 = vmul.f32 1.442695, %v44_v2 }
  0x12   :  { %84 = vpow2.f32 %v45_v3 }
  0x18   :  { %v85_v4 = vpop.eup %84 }
  0x19   :  { %v47_v5 = vadd.f32 1.0, %v85_v4  ;;  %v50_v6 = vmul.f32 -0.5, %v85_v4  ;;  %v53_v8 = vand.u32 2147483647, %v85_v4 }
  0x1b   :  { %86 = vlog2.f32 %v47_v5  ;;  %v51_v7 = vadd.f32 1.0, %v50_v6  ;;  %vm54_vm0 = vcmp.lt.f32.partialorder %v53_v8, 0.0004427343 }
  0x1d   :  { %v52_v9 = vmul.f32 %v85_v4, %v51_v7 }
  0x21   :  { %v87_v10 = vpop.eup %86 }
  0x22   :  { %v49_v12 = vmul.f32 0.6931472, %v87_v10 }
  0x24   :  { %v55_v14 = vsel %vm54_vm0, %v52_v9, %v49_v12 }
  0x25   :  { %v57_v15 = vadd.f32 %v56_v11, %v55_v14 }
  0x27   :  { %v58_v17 = vsub.f32 %v57_v15, %v40_v0  ;;  %v59_v18 = vmul.f32 %v57_v15, %v41_v13 }
  0x29   :  { %v60_v19 = vmul.f32 %v58_v17, %v42_v16 }
  0x2b   :  { %v61_v20 = vsub.f32 %v59_v18, %v60_v19 }
  0x2d   :  { %62 = vst [vmem:[#allocation7] sm:$0x1] %v61_v20 }
  0x2e   :  { %73 = dma.vmem_to_hbm [thread:$0]  %s69_s1, 16, %s71_s21, [#allocation4]  }
  0x2f   :  { %164 = dma.done.wait [#allocation4], 16  }
  0x30   :  { %165 = vsyncadd [#allocation4], 4294967280 }
  0x31   :  { %78 = vsyncpa [#allocation3], 1 }
  0x32   :  { %79 = vsyncpa [#allocation6], 1 }
  0x33   :  { %80 = vsyncpa [#allocation4], 1 }

</bundles_post_ra>
